<compile_context>
chip_gen: v7x
topology: tpu7x:2x2x1
jax: 0.10.0
libtpu: 0.0.40
codegen_flags: <defaults>
</compile_context>

<pallas_src>
import functools

import jax
import jax.numpy as jnp
from jax.experimental import pallas as pl
from jax.experimental.pallas import tpu as pltpu

LN_EPS = 1e-5  # torch.nn.LayerNorm default


def _round_up(n, m):
    return ((n + m - 1) // m) * m


def _cdiv(a, b):
    return (a + b - 1) // b


def _vmem_capacity_bytes():
    """Per-TensorCore VMEM capacity; conservative (v7x-sized) fallback."""
    try:
        info = pltpu.get_tpu_info()
        cap = getattr(info, "vmem_capacity_bytes", None)
        if cap:
            return int(cap)
    except Exception:
        pass
    return 64 * 1024 * 1024


def prepare_params(params):
    """One-time parameter prep (do NOT call per forward pass).

    Folds the LayerNorm affine into the first linear (w1' = gamma[:,None]*w1,
    b1' = b1 + beta@w1), casts weights to bf16 and zero-pads everything to
    lane-dense (multiple-of-128) shapes.
    """
    gamma = params["gamma"].astype(jnp.float32)
    beta = params["beta"].astype(jnp.float32)
    w1 = params["w1"].astype(jnp.float32)
    b1 = params["b1"].astype(jnp.float32)
    w2 = params["w2"].astype(jnp.float32)
    b2 = params["b2"].astype(jnp.float32)

    dim, hidden = w1.shape
    dim_p = _round_up(dim, 128)
    hid_p = _round_up(hidden, 128)

    w1_eff = gamma[:, None] * w1                     # (dim, hidden)
    b1_eff = b1 + beta @ w1                          # (hidden,)

    w1p = jnp.zeros((dim_p, hid_p), jnp.bfloat16).at[:dim, :hidden].set(
        w1_eff.astype(jnp.bfloat16))
    b1p = jnp.zeros((1, hid_p), jnp.float32).at[0, :hidden].set(b1_eff)
    w2p = jnp.zeros((hid_p, dim_p), jnp.bfloat16).at[:hidden, :dim].set(
        w2.astype(jnp.bfloat16))
    b2p = jnp.zeros((1, dim_p), jnp.float32).at[0, :dim].set(b2)

    return {
        "w1p": w1p, "b1p": b1p, "w2p": w2p, "b2p": b2p,
        "dim": dim, "hidden": hidden, "dim_p": dim_p, "hid_p": hid_p,
    }


def _ffn_kernel(x_ref, w1_ref, b1_ref, w2_ref, b2_ref, o_ref, xn_ref,
                *maybe_acc, inv_dim, true_dim, dim_padded):
    """Grid = (row tiles ['parallel'], hidden tiles ['arbitrary' reduction])."""
    acc_ref = maybe_acc[0] if maybe_acc else o_ref   # fp32 accumulator
    k = pl.program_id(1)

    # --- LayerNorm once per row tile (affine folded into w1/b1) --------------
    @pl.when(k == 0)
    def _():
        x = x_ref[...].astype(jnp.float32)                        # (tm, dim_p)
        mean = jnp.sum(x, axis=-1, keepdims=True) * inv_dim
        centered = x - mean
        if dim_padded:
            # mask padded feature lanes so the two-pass variance is exact and
            # padded lanes of xn are exactly zero
            lane = jax.lax.broadcasted_iota(jnp.int32, x.shape, x.ndim - 1)
            centered = jnp.where(lane < true_dim, centered, 0.0)
        var = jnp.sum(centered * centered, axis=-1, keepdims=True) * inv_dim
        xn = centered * jax.lax.rsqrt(var + LN_EPS)
        xn_ref[...] = xn.astype(xn_ref.dtype)                     # bf16 for MXU
        acc_ref[...] = jnp.zeros_like(acc_ref)

    # TODO(synk): optionally split the first matmul into two dim-halves to overlap
    # the k==0 normalization with the MXU start; currently left to the scheduler.

    # --- Linear(dim -> hidden tile) + ReLU (bf16 operands, fp32 accum) -------
    h = jnp.dot(xn_ref[...], w1_ref[...],
                preferred_element_type=jnp.float32) + b1_ref[...]
    h = jnp.maximum(h, 0.0)

    # --- Partial Linear(hidden tile -> dim), fp32 accumulation ---------------
    acc_ref[...] += jnp.dot(h.astype(jnp.bfloat16), w2_ref[...],
                            preferred_element_type=jnp.float32).astype(acc_ref.dtype)

    # --- finalize on the last hidden tile -------------------------------------
    @pl.when(k == pl.num_programs(1) - 1)
    def _():
        if maybe_acc:
            o_ref[...] = (acc_ref[...] + b2_ref[...]).astype(o_ref.dtype)
        else:
            o_ref[...] = o_ref[...] + b2_ref[...]


def _select_tiles(M, dim_p, hid_p, io_bytes, use_acc, vmem_cap):
    """Generation-aware tile / vmem-limit selection."""
    vmem_limit = int(vmem_cap * 3 // 4)               # leave ~25% headroom
    two_tc = vmem_cap <= 64 * 1024 * 1024             # v7x heuristic (2 TCs/chip)

    # row tile
    M8 = _round_up(max(M, 1), 8)
    tm_target = 512 if vmem_limit >= 80 * 1024 * 1024 else 256
    tm = min(tm_target, M8)
    if two_tc and M8 >= 16 and _cdiv(M8, tm) < 2:
        tm = _round_up(_cdiv(M8, 2), 8)               # >= 2 parallel row tiles
    M_p = _round_up(M, tm)

    # hidden tile from the remaining VMEM budget
    act_bytes = (2 * tm * dim_p * io_bytes            # x (double-buffered)
                 + 2 * tm * dim_p * io_bytes          # out (double-buffered)
                 + tm * dim_p * 2                     # xn bf16 scratch
                 + (tm * dim_p * 4 if use_acc else 0))
    weight_budget = vmem_limit - act_bytes - 2 * 1024 * 1024
    tk = max(128, (min(hid_p, 2048) // 128) * 128)
    # double-buffered w1 + w2 per step: 2 bufs * 2 mats * dim_p * tk * 2B
    while tk > 128 and (hid_p % tk != 0 or 8 * dim_p * tk > weight_budget):
        tk -= 128
    return tm, M_p, tk, vmem_limit


def feed_forward(x, prepped):
    """x: (..., dim).  prepped: output of prepare_params()."""
    dim = prepped["dim"]
    dim_p = prepped["dim_p"]
    hid_p = prepped["hid_p"]
    orig_shape = x.shape

    x2 = x.reshape(-1, dim)
    M = x2.shape[0]

    out_dtype = x.dtype
    use_acc = out_dtype != jnp.float32     # fp32 out -> accumulate directly in o_ref
    io_bytes = x.dtype.itemsize

    vmem_cap = _vmem_capacity_bytes()
    tm, M_p, tk, vmem_limit = _select_tiles(M, dim_p, hid_p, io_bytes, use_acc, vmem_cap)

    needs_pad = (dim_p != dim) or (M_p != M)
    if needs_pad:
        x2p = jnp.zeros((M_p, dim_p), x.dtype).at[:M, :dim].set(x2)
    else:
        x2p = x2

    scratch = [pltpu.VMEM((tm, dim_p), jnp.bfloat16)]          # normalized x (bf16)
    if use_acc:
        scratch.append(pltpu.VMEM((tm, dim_p), jnp.float32))   # fp32 accumulator

    kernel = functools.partial(
        _ffn_kernel, inv_dim=1.0 / dim, true_dim=dim, dim_padded=(dim_p != dim))

    out = pl.pallas_call(
        kernel,
        out_shape=jax.ShapeDtypeStruct((M_p, dim_p), out_dtype),
        grid_spec=pltpu.PrefetchScalarGridSpec(
            num_scalar_prefetch=0,
            grid=(M_p // tm, hid_p // tk),
            in_specs=[
                pl.BlockSpec((tm, dim_p), lambda i, k: (i, 0)),   # x rows
                pl.BlockSpec((dim_p, tk), lambda i, k: (0, k)),   # w1 (hidden tile)
                pl.BlockSpec((1, tk), lambda i, k: (0, k)),       # b1 (hidden tile)
                pl.BlockSpec((tk, dim_p), lambda i, k: (k, 0)),   # w2 (hidden tile)
                pl.BlockSpec((1, dim_p), lambda i, k: (0, 0)),    # b2
            ],
            out_specs=pl.BlockSpec((tm, dim_p), lambda i, k: (i, 0)),
            scratch_shapes=scratch,
        ),
        compiler_params=pltpu.CompilerParams(
            dimension_semantics=("parallel", "arbitrary"),
            vmem_limit_bytes=int(vmem_limit),
        ),
    )(x2p, prepped["w1p"], prepped["b1p"], prepped["w2p"], prepped["b2p"])

    if needs_pad:
        out = out[:M, :dim]
    return out.reshape(orig_shape)


def init_params(key, dim, hidden_dim):
    """Deterministic synthetic parameters (shapes match the torch module)."""
    hidden = max(dim, hidden_dim)   # mirrors torch: hidden_dim = max(dim, hidden_dim)
    k1, k2, k3, k4 = jax.random.split(key, 4)
    bound1 = 1.0 / jnp.sqrt(dim)
    bound2 = 1.0 / jnp.sqrt(hidden)
    return {
        "gamma": jnp.ones((dim,), jnp.float32),
        "beta": jnp.zeros((dim,), jnp.float32),
        "w1": jax.random.uniform(k1, (dim, hidden), jnp.float32, -bound1, bound1),
        "b1": jax.random.uniform(k2, (hidden,), jnp.float32, -bound1, bound1),
        "w2": jax.random.uniform(k3, (hidden, dim), jnp.float32, -bound2, bound2),
        "b2": jax.random.uniform(k4, (dim,), jnp.float32, -bound2, bound2),
    }


def _reference(x, p):
    """Pure fp32 reference of the torch forward."""
    mean = jnp.mean(x, axis=-1, keepdims=True)
    var = jnp.mean((x - mean) ** 2, axis=-1, keepdims=True)
    xn = (x - mean) / jnp.sqrt(var + LN_EPS) * p["gamma"] + p["beta"]
    h = jnp.maximum(xn @ p["w1"] + p["b1"], 0.0)
    return h @ p["w2"] + p["b2"]


if __name__ == "__main__":
    key = jax.random.PRNGKey(0)
    kx, kp = jax.random.split(key)

    batch, seq, dim, hidden_dim = 2, 8, 32, 64
    x = jax.random.normal(kx, (batch, seq, dim), jnp.float32)
    params = init_params(kp, dim, hidden_dim)

    prepped = prepare_params(params)            # one-time weight prep (folded + padded)
    out = jax.block_until_ready(feed_forward(x, prepped))

    ref = _reference(x, params)
    assert out.shape == x.shape
    # bf16 MXU operands (fp32 accumulation) -> compare against fp32 reference
    # with a correspondingly looser tolerance.
    max_err = float(jnp.max(jnp.abs(out - ref)))
    assert jnp.allclose(out, ref, atol=5e-2, rtol=5e-2), (
        f"mismatch vs reference (max abs err {max_err})")
    print("KERNEL_OK")
</pallas_src>

<mosaic_0001>
module attributes {stable_mosaic.version = 11 : i64} {
  func.func @_ffn_kernel(%arg0: i32, %arg1: i32, %arg2: memref<8x128xf32, #tpu.memory_space<vmem>>, %arg3: memref<128x128xbf16, #tpu.memory_space<vmem>>, %arg4: memref<1x128xf32, #tpu.memory_space<vmem>>, %arg5: memref<128x128xbf16, #tpu.memory_space<vmem>>, %arg6: memref<1x128xf32, #tpu.memory_space<vmem>>, %arg7: memref<8x128xf32, #tpu.memory_space<vmem>>, %arg8: memref<8x128xbf16, #tpu.memory_space<vmem>>) attributes {dimension_semantics = [#tpu.dimension_semantics<parallel>, #tpu.dimension_semantics<arbitrary>], iteration_bounds = array<i64: 2, 1>, scalar_prefetch = 0 : i64, scratch_operands = 1 : i64, tpu.core_type = #tpu.core_type<tc>, window_params = [{transform_indices = @transform_0, window_bounds = array<i64: 8, 128>}, {transform_indices = @transform_1, window_bounds = array<i64: 128, 128>}, {transform_indices = @transform_2, window_bounds = array<i64: 1, 128>}, {transform_indices = @transform_3, window_bounds = array<i64: 128, 128>}, {pipeline_mode = #tpu.pipeline_mode<synchronous>, transform_indices = @transform_4, window_bounds = array<i64: 1, 128>}, {transform_indices = @transform_5, window_bounds = array<i64: 8, 128>}]} {
    %c0_i32 = arith.constant 0 : i32
    %0 = arith.cmpi eq, %arg1, %c0_i32 : i32
    %1 = arith.extui %0 : i1 to i32
    %c0_i32_0 = arith.constant 0 : i32
    %2 = arith.cmpi ne, %1, %c0_i32_0 : i32
    scf.if %2 {
      %c0_16 = arith.constant 0 : index
      %c0_17 = arith.constant 0 : index
      %20 = vector.load %arg2[%c0_16, %c0_17] : memref<8x128xf32, #tpu.memory_space<vmem>>, vector<8x128xf32>
      %cst_18 = arith.constant dense<0.000000e+00> : vector<8xf32>
      %21 = vector.multi_reduction <add>, %20, %cst_18 [1] : vector<8x128xf32> to vector<8xf32>
      %22 = vector.shape_cast %21 : vector<8xf32> to vector<8x1xf32>
      %cst_19 = arith.constant 3.125000e-02 : f32
      %23 = vector.broadcast %cst_19 : f32 to vector<8x1xf32>
      %24 = arith.mulf %22, %23 : vector<8x1xf32>
      %25 = vector.broadcast %24 : vector<8x1xf32> to vector<8x128xf32>
      %26 = arith.subf %20, %25 : vector<8x128xf32>
      %27 = tpu.iota {dimensions = array<i32: 1>} : vector<8x128xi32>
      %c32_i32 = arith.constant 32 : i32
      %28 = vector.broadcast %c32_i32 : i32 to vector<8x128xi32>
      %29 = arith.cmpi slt, %27, %28 : vector<8x128xi32>
      %cst_20 = arith.constant 0.000000e+00 : f32
      %30 = vector.broadcast %cst_20 : f32 to vector<8x128xf32>
      %31 = arith.select %29, %26, %30 : vector<8x128xi1>, vector<8x128xf32>
      %32 = arith.mulf %31, %31 : vector<8x128xf32>
      %cst_21 = arith.constant dense<0.000000e+00> : vector<8xf32>
      %33 = vector.multi_reduction <add>, %32, %cst_21 [1] : vector<8x128xf32> to vector<8xf32>
      %34 = vector.shape_cast %33 : vector<8xf32> to vector<8x1xf32>
      %cst_22 = arith.constant 3.125000e-02 : f32
      %35 = vector.broadcast %cst_22 : f32 to vector<8x1xf32>
      %36 = arith.mulf %34, %35 : vector<8x1xf32>
      %cst_23 = arith.constant 9.99999974E-6 : f32
      %37 = vector.broadcast %cst_23 : f32 to vector<8x1xf32>
      %38 = arith.addf %36, %37 : vector<8x1xf32>
      %39 = math.rsqrt %38 : vector<8x1xf32>
      %40 = vector.broadcast %39 : vector<8x1xf32> to vector<8x128xf32>
      %41 = arith.mulf %31, %40 : vector<8x128xf32>
      %42 = arith.truncf %41 : vector<8x128xf32> to vector<8x128xbf16>
      %c0_24 = arith.constant 0 : index
      %c0_25 = arith.constant 0 : index
      %43 = vector.load %arg8[%c0_24, %c0_25] : memref<8x128xbf16, #tpu.memory_space<vmem>>, vector<8x128xbf16>
      tpu.vector_store %arg8[%c0_24, %c0_25], %42 {strides = array<i32>} : memref<8x128xbf16, #tpu.memory_space<vmem>>, vector<8x128xbf16>,
      %cst_26 = arith.constant 0.000000e+00 : f32
      %44 = vector.broadcast %cst_26 : f32 to vector<8x128xf32>
      %c0_27 = arith.constant 0 : index
      %c0_28 = arith.constant 0 : index
      %45 = vector.load %arg7[%c0_27, %c0_28] : memref<8x128xf32, #tpu.memory_space<vmem>>, vector<8x128xf32>
      tpu.vector_store %arg7[%c0_27, %c0_28], %44 {strides = array<i32>} : memref<8x128xf32, #tpu.memory_space<vmem>>, vector<8x128xf32>,
    } else {
    }
    %c0 = arith.constant 0 : index
    %c0_1 = arith.constant 0 : index
    %3 = vector.load %arg8[%c0, %c0_1] : memref<8x128xbf16, #tpu.memory_space<vmem>>, vector<8x128xbf16>
    %c0_2 = arith.constant 0 : index
    %c0_3 = arith.constant 0 : index
    %4 = vector.load %arg3[%c0_2, %c0_3] : memref<128x128xbf16, #tpu.memory_space<vmem>>, vector<128x128xbf16>
    %cst = arith.constant dense<0.000000e+00> : vector<8x128xf32>
    %5 = tpu.matmul %3, %4, %cst {dimension_numbers = #tpu.dot_dimension_numbers<[1], [0], [0], [1], [0, 0, 1, 1], [], []>} : vector<8x128xbf16>, vector<128x128xbf16>, vector<8x128xf32> -> vector<8x128xf32>
    %c0_4 = arith.constant 0 : index
    %c0_5 = arith.constant 0 : index
    %6 = vector.load %arg4[%c0_4, %c0_5] : memref<1x128xf32, #tpu.memory_space<vmem>>, vector<1x128xf32>
    %7 = vector.broadcast %6 : vector<1x128xf32> to vector<8x128xf32>
    %8 = arith.addf %5, %7 : vector<8x128xf32>
    %cst_6 = arith.constant 0.000000e+00 : f32
    %9 = vector.broadcast %cst_6 : f32 to vector<8x128xf32>
    %10 = arith.maximumf %8, %9 : vector<8x128xf32>
    %c0_7 = arith.constant 0 : index
    %c0_8 = arith.constant 0 : index
    %11 = vector.load %arg7[%c0_7, %c0_8] : memref<8x128xf32, #tpu.memory_space<vmem>>, vector<8x128xf32>
    %12 = arith.truncf %10 : vector<8x128xf32> to vector<8x128xbf16>
    %c0_9 = arith.constant 0 : index
    %c0_10 = arith.constant 0 : index
    %13 = vector.load %arg5[%c0_9, %c0_10] : memref<128x128xbf16, #tpu.memory_space<vmem>>, vector<128x128xbf16>
    %cst_11 = arith.constant dense<0.000000e+00> : vector<8x128xf32>
    %14 = tpu.matmul %12, %13, %cst_11 {dimension_numbers = #tpu.dot_dimension_numbers<[1], [0], [0], [1], [0, 0, 1, 1], [], []>} : vector<8x128xbf16>, vector<128x128xbf16>, vector<8x128xf32> -> vector<8x128xf32>
    %15 = arith.addf %11, %14 : vector<8x128xf32>
    %c0_12 = arith.constant 0 : index
    %c0_13 = arith.constant 0 : index
    %16 = vector.load %arg7[%c0_12, %c0_13] : memref<8x128xf32, #tpu.memory_space<vmem>>, vector<8x128xf32>
    tpu.vector_store %arg7[%c0_12, %c0_13], %15 {strides = array<i32>} : memref<8x128xf32, #tpu.memory_space<vmem>>, vector<8x128xf32>,
    %c0_i32_14 = arith.constant 0 : i32
    %17 = arith.cmpi eq, %arg1, %c0_i32_14 : i32
    %18 = arith.extui %17 : i1 to i32
    %c0_i32_15 = arith.constant 0 : i32
    %19 = arith.cmpi ne, %18, %c0_i32_15 : i32
    scf.if %19 {
      %c0_16 = arith.constant 0 : index
      %c0_17 = arith.constant 0 : index
      %20 = vector.load %arg7[%c0_16, %c0_17] : memref<8x128xf32, #tpu.memory_space<vmem>>, vector<8x128xf32>
      %c0_18 = arith.constant 0 : index
      %c0_19 = arith.constant 0 : index
      %21 = vector.load %arg6[%c0_18, %c0_19] : memref<1x128xf32, #tpu.memory_space<vmem>>, vector<1x128xf32>
      %22 = vector.broadcast %21 : vector<1x128xf32> to vector<8x128xf32>
      %23 = arith.addf %20, %22 : vector<8x128xf32>
      %c0_20 = arith.constant 0 : index
      %c0_21 = arith.constant 0 : index
      %24 = vector.load %arg7[%c0_20, %c0_21] : memref<8x128xf32, #tpu.memory_space<vmem>>, vector<8x128xf32>
      tpu.vector_store %arg7[%c0_20, %c0_21], %23 {strides = array<i32>} : memref<8x128xf32, #tpu.memory_space<vmem>>, vector<8x128xf32>,
    } else {
    }
    return
  }
  func.func @transform_0(%arg0: i32, %arg1: i32) -> (i32, i32) {
    %c0_i32 = arith.constant 0 : i32
    %c0_i32_0 = arith.constant 0 : i32
    return %arg0, %c0_i32 : i32, i32
  }
  func.func @transform_1(%arg0: i32, %arg1: i32) -> (i32, i32) {
    %c0_i32 = arith.constant 0 : i32
    %c0_i32_0 = arith.constant 0 : i32
    return %c0_i32, %arg1 : i32, i32
  }
  func.func @transform_2(%arg0: i32, %arg1: i32) -> (i32, i32) {
    %c0_i32 = arith.constant 0 : i32
    %c0_i32_0 = arith.constant 0 : i32
    return %c0_i32, %arg1 : i32, i32
  }
  func.func @transform_3(%arg0: i32, %arg1: i32) -> (i32, i32) {
    %c0_i32 = arith.constant 0 : i32
    %c0_i32_0 = arith.constant 0 : i32
    return %arg1, %c0_i32 : i32, i32
  }
  func.func @transform_4(%arg0: i32, %arg1: i32) -> (i32, i32) {
    %c0_i32 = arith.constant 0 : i32
    %c0_i32_0 = arith.constant 0 : i32
    %c0_i32_1 = arith.constant 0 : i32
    return %c0_i32, %c0_i32_0 : i32, i32
  }
  func.func @transform_5(%arg0: i32, %arg1: i32) -> (i32, i32) {
    %c0_i32 = arith.constant 0 : i32
    %c0_i32_0 = arith.constant 0 : i32
    return %arg0, %c0_i32 : i32, i32
  }
}

</mosaic_0001>

<bundles_post_ra>
// kernel: tpu_custom_call.1
= control target key start
LH: loop header
LB: loop body
LE: loop exit
PB: predicated region body
PF: predicated region fallthrough
CT: control target
= control target key end

     0   :  { %10 = vsyncpa [#allocation4], 0  ;;  %s1385_s0 = inlined_call_operand.hbm [shape: f32[16,128], index: 0, kind: input, shape index: {}]   ;;  %s1386_s1 = inlined_call_operand.hbm [shape: bf16[128,128], index: 1, kind: input, shape index: {}]   ;;  %s1387_s2 = inlined_call_operand.vmem [shape: f32[1,128], index: 2, kind: input, shape index: {}]   ;;  %s1388_s3 = inlined_call_operand.hbm [shape: bf16[128,128], index: 3, kind: input, shape index: {}]   ;;  %s1389_s4 = inlined_call_operand.vmem [shape: f32[1,128], index: 4, kind: input, shape index: {}]   ;;  %s1390_s5 = inlined_call_operand.hbm [shape: f32[16,128], index: 5, kind: output, shape index: {}]  }
   0x1   :  { %12 = vsyncpa [#allocation4 + $0x1], 0 }
   0x2   :  { %13 = vsyncpa [#allocation7], 0 }
   0x3   :  { %14 = vsyncpa [#allocation5], 0 }
   0x4   :  { %16 = vsyncpa [#allocation5 + $0x1], 0  ;;  %s1107_s18 = smov 0   ;;  %s1109_s19 = smov 0  }
   0x5   :  { %s1111_s20 = smov 0   ;;  %s1113_s21 = smov 0  }
   0x6   :  { %s1115_s22 = smov 0   ;;  %s1117_s23 = smov 0  }
   0x7 LB: > { %s696_s24 = sadd.s32 4294967295, %s1067_s23   ;;  %s697_s25 = sadd.s32 4294967294, %s1067_s23   ;;  %s1067_s23 = sphi %s1117_s23, %s22_s23   ;;  %s1063_s22 = sphi %s1115_s22, %s1412_s22   ;;  %s1059_s21 = sphi %s1113_s21, %s1411_s21   ;;  %s1055_s20 = sphi %s1111_s20, %s1410_s20   ;;  %s1051_s19 = sphi %s1109_s19, %s1409_s19   ;;  %s1047_s18 = sphi %s1107_s18, %s1408_s18  }
   0x8   : > { %p54_p0 = scmp.ne.s32.totalorder %s1051_s19, %s1047_s18  ;;  %p1141_p1 = scmp.eq.s32.totalorder %s696_s24, 0 }
   0x9   : > { %p1145_p2 = scmp.eq.s32.totalorder %s696_s24, 1  ;;  %p183_p3 = scmp.eq.s32.totalorder %s697_s25, 1 }
   0xa   : > { %s1395_s26 = scalar_select %p1141_p1, 1, 0 }
   0xb   : > { %p1151_p4 = por %p1141_p1, %p54_p0  ;;  %p698_p5 = scmp.ge.s32.totalorder %s1067_s23, 1 }
   0xc   : > { %p1156_p6 = por %p183_p3, %p54_p0  ;;  %p190_p7 = scmp.lt.s32.totalorder %s1067_s23, 3 }
   0xd   : > { %s1397_s28 = scalar_select %p1151_p4, 1, 0 }
   0xe   : > { %s1398_s29 = scalar_select %p1156_p6, 1, 0 }
   0xf   : > { %p1161_p8 = pnand %p698_p5, %p190_p7  ;;  %s1069_s6 = smov [#allocation6]  }
  0x10   : > { %s204_s7 = sshll.u32 %s1069_s6, 4  ;;  %s1070_s9 = smov [#allocation8]   ;;  %s1165_s7 = int_to_ptr.vmem [resolvable:$true] %s204_s7 }
  0x11   : > { %p802_p9 = pneg %p1161_p8  ;;  %s226_s10 = sshll.u32 %s1070_s9, 4  ;;  %s1176_s10 = int_to_ptr.vmem [resolvable:$true] %s226_s10 }
  0x12   : > { %s895_s13 = scalar_lea.hbm %s1386_s1, 1024 }
  0x13   : > { %p1172_p11 = pnand %p802_p9, %p1141_p1  ;;  %p896_p12 = scmp.ne.s32.totalorder %s1386_s1, %s895_s13 }
  0x14   : > { %p902_p5 = scmp.lt.u32.totalorder %s895_s13, %s1386_s1 }
  0x15   : > { %p897_p13 = pneg %p1172_p11 }
  0x17   : > { %p898_p0 = pnand %p897_p13, %p896_p12 }
  0x19   : > { %p899_p3 = pneg %p898_p0 }
  0x1b   : > { %p904_p7 = pnand %p902_p5, %p899_p3 }
  0x1d   : > { %907 = shalt.err (!%p904_p7)
}
  0x1e   : > { %s908_s24 = scalar_lea.vmem %s1165_s7, 1024  ;;  %p916_p1 = scmp.lt.s32.totalorder %s1165_s7, %s1165_s7 }
  0x1f   : > { %p909_p9 = scmp.ne.s32.totalorder %s1165_s7, %s908_s24  ;;  %p917_p12 = scmp.lt.s32.totalorder %s908_s24, %s908_s24 }
  0x21   : > { %p911_p10 = pnand %p909_p9, %p897_p13  ;;  %p918_p0 = por %p917_p12, %p916_p1 }
  0x23   : > { %p912_p6 = pneg %p911_p10 }
  0x25   : > { %p919_p4 = pnand %p918_p0, %p912_p6 }
  0x27   : > { %922 = shalt.err (!%p919_p4)
}
  0x28   : > { %s1071_s25 = smov 64   ;;  %s1072_s6 = smov 4  }
  0x29   : > { %805 = dma.hbm_to_vmem [thread:$0]  (!%p1172_p11), %s1386_s1, 1024, %s1165_s7, [#allocation7], %s1071_s25, %s1071_s25, %s1072_s6  }
  0x2a   : > { %s923_s14 = scalar_lea.hbm %s1388_s3, 1024 }
  0x2b   : > { %p924_p1 = scmp.ne.s32.totalorder %s1388_s3, %s923_s14  ;;  %p930_p10 = scmp.lt.u32.totalorder %s923_s14, %s1388_s3 }
  0x2d   : > { %p926_p4 = pnand %p924_p1, %p897_p13 }
  0x2f   : > { %p927_p6 = pneg %p926_p4 }
  0x31   : > { %p932_p3 = pnand %p930_p10, %p927_p6 }
  0x33   : > { %935 = shalt.err (!%p932_p3)
}
  0x34   : > { %s936_s7 = scalar_lea.vmem %s1176_s10, 1024  ;;  %p944_p12 = scmp.lt.s32.totalorder %s1176_s10, %s1176_s10 }
  0x35   : > { %p937_p5 = scmp.ne.s32.totalorder %s1176_s10, %s936_s7  ;;  %p945_p0 = scmp.lt.s32.totalorder %s936_s7, %s936_s7 }
  0x37   : > { %p939_p7 = pnand %p937_p5, %p897_p13  ;;  %p946_p1 = por %p945_p0, %p944_p12 }
  0x39   : > { %p940_p9 = pneg %p939_p7 }
  0x3b   : > { %p947_p4 = pnand %p946_p1, %p940_p9 }
  0x3d   : > { %950 = shalt.err (!%p947_p4)
}
  0x3e   : > { %808 = dma.hbm_to_vmem [thread:$0]  (!%p1172_p11), %s1388_s3, 1024, %s1176_s10, [#allocation7], %s1071_s25, %s1071_s25, %s1072_s6  }
  0x3f   : > { %s34_s12 = sadd.s32 1, %s1063_s22  ;;  %s41_s13 = sadd.s32 1, %s1055_s20 }
  0x40   : > { %p36_p13 = scmp.ge.s32.totalorder %s34_s12, 2  ;;  %p48_p6 = scmp.ne.s32.totalorder %s1055_s20, %s1051_s19 }
  0x41   : > { %p49_p10 = scmp.eq.s32.totalorder %s1067_s23, 0  ;;  %p819_p3 = scmp.lt.s32.totalorder %s1067_s23, 2 }
  0x42   : > { %s1414_s12 = smov (%p36_p13, %s34_s12), 0  ;;  %p1240_p7 = por %p1145_p2, %p48_p6 }
  0x43   : > { %p50_p5 = por %p49_p10, %p48_p6  ;;  %s38_s14 = ssub.s32 %s1063_s22, %s1414_s12 }
  0x44   : > { %s1401_s8 = scalar_select %p1240_p7, 1, 0 }
  0x45   : > { %s243_s15 = sand.u32 1, %s1055_s20   ;;  %p39_p9 = scmp.eq.s32.totalorder %s38_s14, 0 }
  0x46   : > { %s703_s10 = sshll.u32 %s243_s15, 3  ;;  %s704_s25 = sshll.u32 %s1063_s22, 7 }
  0x47   : > { %s1249_s6 = scalar_select %p39_p9, %s1055_s20, %s41_s13  }
  0x48   : > { %s1254_s24 = scalar_lea.hbm %s1385_s0, %s704_s25  ;;  %s247_s27 = scalar_lea.vmem [#allocation3], %s703_s10 }
  0x49   : > { %s254_s7 = sshll.u32 %s247_s27, 4  ;;  %p1258_p2 = pnand %p819_p3, %p50_p5  ;;  %s1262_s7 = int_to_ptr.vmem [resolvable:$true] %s254_s7 }
  0x4a   : > { %s244_s11 = scalar_lea.sflag [#allocation4], %s243_s15  ;;  %s951_s13 = scalar_lea.hbm %s1254_s24, 128 }
  0x4b   : > { %p952_p11 = scmp.ne.s32.totalorder %s1254_s24, %s951_s13  ;;  %p953_p12 = pneg %p1258_p2 }
  0x4c   : > { %s956_s25 = scalar_lea.hbm %s1385_s0, 256  ;;  %p957_p4 = scmp.lt.u32.totalorder %s1254_s24, %s1385_s0 }
  0x4d   : > { %p954_p0 = pnand %p953_p12, %p952_p11  ;;  %p958_p13 = scmp.lt.u32.totalorder %s956_s25, %s951_s13 }
  0x4e   : > { %p960_p10 = scmp.lt.u32.totalorder %s951_s13, %s1254_s24 }
  0x4f   : > { %p955_p1 = pneg %p954_p0  ;;  %p959_p6 = por %p958_p13, %p957_p4 }
  0x51   : > { %p961_p3 = por %p960_p10, %p959_p6 }
  0x53   : > { %p962_p5 = pnand %p961_p3, %p955_p1 }
  0x55   : > { %965 = shalt.err (!%p962_p5)
}
  0x56   : > { %s966_s15 = scalar_lea.vmem %s1262_s7, 128  ;;  %s1073_s27 = smov [#allocation3]  }
  0x57   : > { %p967_p9 = scmp.ne.s32.totalorder %s1262_s7, %s966_s15  ;;  %s971_s14 = sshll.u32 %s1073_s27, 4  ;;  %s972_s14 = int_to_ptr.vmem [resolvable:$false] %s971_s14 }
  0x58   : > { %s973_s10 = scalar_lea.vmem %s972_s14, 256  ;;  %p974_p7 = scmp.lt.s32.totalorder %s1262_s7, %s972_s14 }
  0x59   : > { %p969_p11 = pnand %p967_p9, %p953_p12  ;;  %p975_p4 = scmp.lt.s32.totalorder %s973_s10, %s966_s15 }
  0x5b   : > { %p970_p0 = pneg %p969_p11  ;;  %p976_p13 = por %p975_p4, %p974_p7 }
  0x5d   : > { %p977_p6 = pnand %p976_p13, %p970_p0 }
  0x5f   : > { %980 = shalt.err (!%p977_p6)
}
  0x60   : > { %812 = dma.hbm_to_vmem [thread:$0]  (!%p1258_p2), %s1254_s24, 128, %s1262_s7, %s244_s11  }
  0x61   : > { %263 = sbr.rel (%p1161_p8) target bundleno = 873 (0x369), region = 40  ;;  %s1292_s13 = sand.u32 (!%p1161_p8), 1, %s1051_s19  }
  0x62   : > { %s706_s25 = sshll.u32 (!%p1161_p8), %s1292_s13, 3  ;;  %s266_s16 = scalar_lea.sflag (!%p1161_p8), [#allocation4], %s1292_s13 }
  0x63   : > { %s269_s17 = scalar_lea.vmem (!%p1161_p8), [#allocation3], %s706_s25  ;;  %p1403_p7 = scmp.ne.s32.totalorder (!%p1161_p8), %s1397_s28, 0 }
  0x68   : > { %1034 = dma.done.wait (%p1403_p7), %s266_s16, 128  }
  0x69   : > { %1036 = vsyncadd (%p1403_p7), %s266_s16, 4294967168  ;;  %p1404_p2 = scmp.ne.s32.totalorder %s1395_s26, 0 }
  0x6b   : > { %1038 = dma.done.wait (%p1404_p2), [#allocation7], 2048  }
  0x6c   : > { %1040 = vsyncadd (%p1404_p2), [#allocation7], 4294965248  ;;  %v316_v0 = vld [vmem:[%s269_s17] sm:$0xff]  ;;  %v877_v1 = vld [vmem:[#allocation6] sm:$0xff]   ;;  %v1074_v2 = vmov 0.0   ;;  %v321_v3 = vlaneseq  ;;  %vm1075_vm1 = vmmov 0  }
  0x6d   : > { %317 = vadd.xlane.f32.xlu0 %v316_v0  ;;  %750 = vmatprep.subr.bf16.mxu0 %v1074_v2  ;;  %v878_v10 = vld [vmem:[#allocation6 + $0x8] sm:$0xff]   ;;  %v879_v11 = vld [vmem:[#allocation6 + $0x10] sm:$0xff]   ;;  %v880_v12 = vld [vmem:[#allocation6 + $0x18] sm:$0xff]   ;;  %s729_s7 = sshll.u32 %s1059_s21, 7  ;;  %s306_s9 = scalar_lea.vmem [#allocation9], %s706_s25 }
  0x6e   : > { %770 = vmatprep.subr.bf16.mxu1 %v1074_v2  ;;  %751 = vmatpush3.bf16.msra.mxu0 %v877_v1  ;;  %v322_v4 = vand.u32 127, %v321_v3  ;;  %v881_v13 = vld [vmem:[#allocation6 + $0x20] sm:$0xff]   ;;  %v882_v14 = vld [vmem:[#allocation6 + $0x28] sm:$0xff]   ;;  %v883_v15 = vld [vmem:[#allocation6 + $0x30] sm:$0xff]   ;;  %s583_s11 = sshll.u32 %s306_s9, 4  ;;  %s1336_s14 = scalar_lea.hbm %s1390_s5, %s729_s7  ;;  %s1338_s11 = int_to_ptr.vmem [resolvable:$true] %s583_s11 }
  0x6f   : > { %752 = vmatprep.subr.bf16.mxu0 %v1074_v2  ;;  %v884_v16 = vld [vmem:[#allocation6 + $0x38] sm:$0xff]   ;;  %766 = vmatprep.mubr.msk.bf16.mxu0 %vm1075_vm1, %v1074_v2  ;;  %v885_v17 = vld [vmem:[#allocation8] sm:$0xff]   ;;  %v886_v18 = vld [vmem:[#allocation8 + $0x8] sm:$0xff]   ;;  %s570_s10 = scalar_lea.sflag [#allocation5], %s1292_s13  ;;  %s981_s21 = scalar_lea.vmem %s1338_s11, 128 }
  0x70   : > { %vm323_vm0 = vcmp.lt.s32.totalorder %v322_v4, 32  ;;  %786 = vmatprep.mubr.msk.bf16.mxu1 %vm1075_vm1, %v1074_v2  ;;  %771 = vmatpush3.bf16.msra.mxu1 %v885_v17  ;;  %v887_v19 = vld [vmem:[#allocation8 + $0x10] sm:$0xff]   ;;  %v888_v20 = vld [vmem:[#allocation8 + $0x18] sm:$0xff]   ;;  %v889_v21 = vld [vmem:[#allocation8 + $0x20] sm:$0xff]   ;;  %p982_p8 = scmp.ne.s32.totalorder %s1338_s11, %s981_s21  ;;  %p1405_p12 = scmp.ne.s32.totalorder %s1401_s8, 0 }
  0x71   : > { %772 = vmatprep.subr.bf16.mxu1 %v1074_v2  ;;  %v890_v22 = vld [vmem:[#allocation8 + $0x28] sm:$0xff]   ;;  %v891_v30 = vld [vmem:[#allocation8 + $0x30] sm:$0xff]   ;;  %v892_v31 = vld [vmem:[#allocation8 + $0x38] sm:$0xff]   ;;  %s1076_s25 = smov [#allocation9]  }
  0x72   : > { %753 = vmatpush3.bf16.msra.mxu0 %v878_v10  ;;  %v710_v32 = vld [vmem:[%s1387_s2] ss:$0 sm:$0xff]  ;;  %p983_p1 = pnand %p982_p8, %p1405_p12  ;;  %s985_s16 = sshll.u32 %s1076_s25, 4  ;;  %s986_s16 = int_to_ptr.vmem [resolvable:$false] %s985_s16 }
  0x73   : > { %754 = vmatprep.subr.bf16.mxu0 %v1074_v2  ;;  %v727_v41 = vld [vmem:[%s1389_s4] ss:$0 sm:$0xff]  ;;  %s987_s17 = scalar_lea.vmem %s986_s16, 256  ;;  %p988_p3 = scmp.lt.s32.totalorder %s1338_s11, %s986_s16 }
  0x74   : > { %773 = vmatpush3.bf16.msra.mxu1 %v886_v18  ;;  %p984_p10 = pneg %p983_p1  ;;  %p989_p5 = scmp.lt.s32.totalorder %s987_s17, %s981_s21 }
  0x75   : > { %774 = vmatprep.subr.bf16.mxu1 %v1074_v2 }
  0x76   : > { %755 = vmatpush3.bf16.msra.mxu0 %v879_v11  ;;  %p990_p9 = por %p989_p5, %p988_p3 }
  0x77   : > { %756 = vmatprep.subr.bf16.mxu0 %v1074_v2 }
  0x78   : > { %775 = vmatpush3.bf16.msra.mxu1 %v887_v19  ;;  %p991_p11 = pnand %p990_p9, %p984_p10 }
  0x79   : > { %776 = vmatprep.subr.bf16.mxu1 %v1074_v2 }
  0x7a   : > { %757 = vmatpush3.bf16.msra.mxu0 %v880_v12 }
  0x7b   : > { %758 = vmatprep.subr.bf16.mxu0 %v1074_v2 }
  0x7c   : > { %777 = vmatpush3.bf16.msra.mxu1 %v888_v20 }
  0x7d   : > { %778 = vmatprep.subr.bf16.mxu1 %v1074_v2 }
  0x7e   : > { %759 = vmatpush3.bf16.msra.mxu0 %v881_v13 }
  0x7f   : > { %760 = vmatprep.subr.bf16.mxu0 %v1074_v2 }
  0x80   : > { %779 = vmatpush3.bf16.msra.mxu1 %v889_v21 }
  0x81   : > { %780 = vmatprep.subr.bf16.mxu1 %v1074_v2 }
  0x82   : > { %761 = vmatpush3.bf16.msra.mxu0 %v882_v14 }
  0x83   : > { %762 = vmatprep.subr.bf16.mxu0 %v1074_v2 }
  0x84   : > { %781 = vmatpush3.bf16.msra.mxu1 %v890_v22 }
  0x85   : > { %782 = vmatprep.subr.bf16.mxu1 %v1074_v2 }
  0x86   : > { %763 = vmatpush3.bf16.msra.mxu0 %v883_v15 }
  0x87   : > { %764 = vmatprep.subr.bf16.mxu0 %v1074_v2 }
  0x88   : > { %783 = vmatpush3.bf16.msra.mxu1 %v891_v30 }
  0x89   : > { %784 = vmatprep.subr.bf16.mxu1 %v1074_v2 }
  0x8a   : > { %765 = vmatpush3.bf16.msra.mxu0 %v884_v16 }
  0x8c   : > { %785 = vmatpush3.bf16.msra.mxu1 %v892_v31 }
  0xfa   : > { %v318_v5 = vpop.xlane.xlu0 %317 }
  0xfb   : > { %v319_v6 = vmul.f32 0.03125, %v318_v5 }
  0xfd   : > { %v320_v7 = vsub.f32 %v316_v0, %v319_v6 }
  0xff   : > { %v324_v8 = vsel %vm323_vm0, %v320_v7, 0.0 }
 0x100   : > { %v325_v9 = vmul.f32 %v324_v8, %v324_v8 }
 0x102   : > { %326 = vadd.xlane.f32.xlu0 %v325_v9 }
 0x18f   : > { %v327_v23 = vpop.xlane.xlu0 %326 }
 0x190   : > { %v328_v24 = vmul.f32 0.03125, %v327_v23 }
 0x192   : > { %v329_v25 = vadd.f32 1e-05, %v328_v24 }
 0x194   : > { %893 = vrsqrt.f32 %v329_v25 }
 0x19e   : > { %v894_v26 = vpop.eup %893 }
 0x19f   : > { %v331_v27 = vmul.f32 %v894_v26, %v324_v8 }
 0x1a1   : > { %v332_v28 = vpack.c.bf16 %v331_v27, %v331_v27 }
 0x1a3   : > { %333 = vst [vmem:[#allocation2] sm:$0xf] %v332_v28 }
 0x1aa   : > { %v335_v29 = vld [vmem:[#allocation2] sm:$0xf] }
 0x1ab   : > { %767 = vmatmul.mubr.bf16.vlgmr.msra.gmra.mrb[0].mxu0 %v335_v29 }
 0x27e   : > { %v441_v33 = vpop.f32.mrb[0].mxu0 }
 0x27f   : > { %v442_v34 = vadd.f32 %v710_v32, %v441_v33  ;;  %v768_v35 = vpop.f32.mrb[1].mxu0 }
 0x280   : > { %v444_v36 = vpop.f32.mrb[2].mxu0 }
 0x281   : > { %v447_v37 = vmax.f32 %v442_v34, 0.0  ;;  %v769_v38 = vpop.f32.mrb[3].mxu0 }
 0x283   : > { %v449_v39 = vpack.c.bf16 %v447_v37, %v447_v37 }
 0x285   : > { %787 = vmatmul.mubr.bf16.vlgmr.msra.gmra.mrb[0].mxu1 %v449_v39 }
 0x358   : > { %v548_v40 = vpop.f32.mrb[0].mxu1 }
 0x359   : > { %v788_v42 = vpop.f32.mrb[1].mxu1  ;;  %v567_v45 = vadd.f32 %v727_v41, %v548_v40 }
 0x35a   : > { %v551_v43 = vpop.f32.mrb[2].mxu1 }
 0x35b   : > { %v789_v44 = vpop.f32.mrb[3].mxu1  ;;  %568 = vst [vmem:[%s306_s9] sm:$0xff] %v567_v45 }
 0x35c   : > { %994 = shalt.err (!%p991_p11)
}
 0x35d   : > { %s995_s13 = scalar_lea.hbm %s1336_s14, 128  ;;  %s999_s30 = scalar_lea.hbm %s1390_s5, 256 }
 0x35e   : > { %p996_p0 = scmp.ne.s32.totalorder %s1336_s14, %s995_s13  ;;  %p1000_p6 = scmp.lt.u32.totalorder %s1336_s14, %s1390_s5 }
 0x35f   : > { %p1001_p7 = scmp.lt.u32.totalorder %s999_s30, %s995_s13  ;;  %p1003_p8 = scmp.lt.u32.totalorder %s995_s13, %s1336_s14 }
 0x360   : > { %p997_p4 = pnand %p996_p0, %p1405_p12 }
 0x361   : > { %p1002_p2 = por %p1001_p7, %p1000_p6 }
 0x362   : > { %p998_p13 = pneg %p997_p4 }
 0x363   : > { %p1004_p1 = por %p1003_p8, %p1002_p2 }
 0x365   : > { %p1005_p10 = pnand %p1004_p1, %p998_p13 }
 0x367   : > { %1008 = shalt.err (!%p1005_p10)
}
 0x368   : > { %800 = dma.vmem_to_hbm [thread:$0]  (%p1405_p12), %s1338_s11, 128, %s1336_s14, %s570_s10  }
 0x369 PF: > { %s595_s9 = sand.u32 1, %s1047_s18   ;;  %p1406_p3 = scmp.ne.s32.totalorder %s1398_s29, 0 }
 0x36a   : > { %p1407_p5 = scmp.ge.s32.totalorder %s1067_s23, 2  ;;  %s596_s15 = scalar_lea.sflag [#allocation5], %s595_s9 }
 0x36c   : > { %p814_p9 = pnand %p1407_p5, %p1406_p3 }
 0x36e   : > { %1042 = dma.done.wait (!%p814_p9), %s596_s15, 128  }
 0x36f   : > { %1044 = vsyncadd (!%p814_p9), %s596_s15, 4294967168  ;;  %s22_s23 = sadd.s32 1, %s1067_s23   ;;  %s1408_s18 = smov %s1051_s19 }
 0x370   : > { %p19_p11 = scmp.ge.s32.totalorder %s22_s23, 4   ;;  %s1409_s19 = smov %s1055_s20 }
 0x371   : > { %s1410_s20 = smov %s1249_s6  ;;  %s1411_s21 = smov %s1063_s22 }
 0x372   : > { %s1412_s22 = smov %s1414_s12  ;;  %21 = sbr.rel (!%p19_p11) target bundleno = 7 (0x7), region = 106 }
 0x379   :  { %601 = vsyncpa [#allocation4], 1 }
 0x37a   :  { %603 = vsyncpa [#allocation4 + $0x1], 1 }
 0x37b   :  { %604 = vsyncpa [#allocation7], 1 }
 0x37c   :  { %605 = vsyncpa [#allocation5], 1 }
 0x37d   :  { %607 = vsyncpa [#allocation5 + $0x1], 1 }

</bundles_post_ra>
